<compile_context>
chip_gen: v5e
topology: v5e:2x2
jax: 0.10.0
libtpu: 0.0.40
codegen_flags: <defaults>
</compile_context>

<pallas_src>
import functools

import jax
import jax.numpy as jnp
from jax.experimental import pallas as pl
from jax.experimental.pallas import tpu as pltpu

OBS_DIM = 32              # flat observation size
HIDDEN = 128              # hidden size (lane aligned)
NVEC = (3, 4)             # MultiDiscrete action space nvec
NUM_LOGITS = sum(NVEC)    # concatenated logits width (7)
VALUE_COL = NUM_LOGITS    # critic column inside the fused head
HEAD_PAD = 128            # fused actor+critic head width (zero-padded, lane aligned)
MAX_BATCH_TILE = 4096     # rows per grid step (sweepable)
MIN_GRID = 2              # keep >= 2 grid steps when possible (v7x has 2 TensorCores)


def _round_up(n, m):
    return ((n + m - 1) // m) * m


def _policy_kernel(x_ref, we_ref, be_ref, wh_ref, bh_ref, logits_ref, value_ref):
    # --- encode_observations: hidden = relu(obs @ W_enc + b_enc) ---
    # Cast obs to bf16 in-kernel (free VPU op; only the f32 obs stream touches HBM).
    # MXU accumulates in f32; bias add / ReLU stay in f32 (v5e VPU has no bf16).
    x = x_ref[...].astype(jnp.bfloat16)
    h = jnp.dot(x, we_ref[...], preferred_element_type=jnp.float32)
    h = jnp.maximum(h + be_ref[...], 0.0)
    # --- decode_actions: fused actor+critic head ---
    # Lane-dense (TILE, 128) matmul in VMEM; only the useful 7 logit lanes + 1 value
    # lane are stored back to HBM (compute has huge slack, HBM writeback does not).
    y = jnp.dot(h.astype(jnp.bfloat16), wh_ref[...],
                preferred_element_type=jnp.float32)
    y = y + bh_ref[...]
    logits_ref[...] = y[:, :NUM_LOGITS]
    value_ref[...] = y[:, VALUE_COL:VALUE_COL + 1]


@functools.partial(jax.jit, static_argnames=("max_tile",))
def policy_forward(x, params, max_tile=MAX_BATCH_TILE):
    """Fused forward pass: (action_logits, value) = Policy.forward(env_outputs)."""
    we, be, wh, bh = params
    B = x.shape[0]

    # Batch tile: as big as max_tile, 8-row aligned (f32 input stream), capped so the
    # grid has at least MIN_GRID steps when B allows.  No padding pass over the obs:
    # the ragged last block is handled by Pallas (masked writeback).
    b8 = _round_up(max(B, 1), 8)
    tile = max(8, min(max_tile, _round_up(pl.cdiv(b8, MIN_GRID), 8), b8))
    grid = (pl.cdiv(B, tile),)

    def resident_spec(arr):
        # Whole-array block with a constant index map: resident in VMEM across all
        # grid steps; single-buffered since it is never re-fetched.
        nd = arr.ndim
        return pl.BlockSpec(arr.shape, lambda i, _nd=nd: (0,) * _nd,
                            pipeline_mode=pl.Buffered(buffer_count=1))

    itemsize = lambda a: a.size * a.dtype.itemsize
    cost = pl.CostEstimate(
        flops=2 * B * (OBS_DIM * HIDDEN + HIDDEN * HEAD_PAD),
        transcendentals=0,
        bytes_accessed=(itemsize(x) + itemsize(we) + itemsize(be)
                        + itemsize(wh) + itemsize(bh)
                        + B * NUM_LOGITS * 4 + B * 4),
    )

    logits, value = pl.pallas_call(
        _policy_kernel,
        out_shape=(jax.ShapeDtypeStruct((B, NUM_LOGITS), jnp.float32),
                   jax.ShapeDtypeStruct((B, 1), jnp.float32)),
        grid=grid,
        in_specs=[
            pl.BlockSpec((tile, OBS_DIM), lambda i: (i, 0)),   # obs tile (f32 stream)
            resident_spec(we), resident_spec(be),              # encoder (bf16 W, f32 b)
            resident_spec(wh), resident_spec(bh),              # fused actor+critic head
        ],
        out_specs=(pl.BlockSpec((tile, NUM_LOGITS), lambda i: (i, 0)),
                   pl.BlockSpec((tile, 1), lambda i: (i, 0))),
        compiler_params=pltpu.CompilerParams(
            dimension_semantics=("parallel",)),                # megacore-shardable batch
        cost_estimate=cost,
    )(x, we, be, wh, bh)

    return logits, value.reshape(B)


def policy_forward_ref(x, params):
    """Pure-JAX reference on the same bf16 weight path (for correctness check)."""
    we, be, wh, bh = params
    xb = x.astype(jnp.bfloat16)
    h = jnp.maximum(jnp.dot(xb, we, preferred_element_type=jnp.float32) + be, 0.0)
    y = jnp.dot(h.astype(jnp.bfloat16), wh, preferred_element_type=jnp.float32) + bh
    return y[:, :NUM_LOGITS], y[:, VALUE_COL]


def init_params(key):
    """Deterministic PyTorch-Linear-style init (uniform +-1/sqrt(fan_in)).

    Weights are stored pre-transposed as (in_dim, out_dim) so the kernel computes
    x @ W + b == torch.nn.Linear's x @ W.T + b.  The actor and critic heads are packed
    into one (HIDDEN, 128) matrix whose padding columns are zero, so the narrowed
    outputs reproduce the unfused result exactly.
    """
    ks = jax.random.split(key, 6)

    def lin(kw, kb, fan_in, fan_out):
        bound = 1.0 / jnp.sqrt(jnp.float32(fan_in))
        w = jax.random.uniform(kw, (fan_in, fan_out), jnp.float32, -bound, bound)
        b = jax.random.uniform(kb, (fan_out,), jnp.float32, -bound, bound)
        return w, b

    we, be = lin(ks[0], ks[1], OBS_DIM, HIDDEN)
    wa, ba = lin(ks[2], ks[3], HIDDEN, NUM_LOGITS)
    wv, bv = lin(ks[4], ks[5], HIDDEN, 1)

    wh = jnp.zeros((HIDDEN, HEAD_PAD), jnp.float32)
    wh = wh.at[:, :NUM_LOGITS].set(wa).at[:, VALUE_COL:VALUE_COL + 1].set(wv)
    bh = jnp.zeros((1, HEAD_PAD), jnp.float32)
    bh = bh.at[0, :NUM_LOGITS].set(ba).at[0, VALUE_COL].set(bv[0])

    return (we.astype(jnp.bfloat16),          # encoder weight, bf16 for the MXU
            be.reshape(1, HIDDEN),            # encoder bias, f32
            wh.astype(jnp.bfloat16),          # fused actor+critic weight, bf16
            bh)                               # fused bias, f32


# TODO(synk): the optional recurrent (LSTM) cell between encode/decode and the
# Categorical action sampling live outside Policy.forward and are not implemented here.

if __name__ == "__main__":
    key = jax.random.PRNGKey(0)
    k_obs, k_par, k_big = jax.random.split(key, 3)
    params = init_params(k_par)

    # Small deterministic demo batch (correctness check).
    batch = 8
    env_outputs = jax.random.normal(k_obs, (batch, OBS_DIM), jnp.float32)
    actions, value = policy_forward(env_outputs, params)
    jax.block_until_ready((actions, value))

    assert actions.shape == (batch, NUM_LOGITS)
    assert value.shape == (batch,)
    ref_actions, ref_value = policy_forward_ref(env_outputs, params)
    assert bool(jnp.allclose(actions, ref_actions, atol=5e-2, rtol=5e-2))
    assert bool(jnp.allclose(value, ref_value, atol=5e-2, rtol=5e-2))

    # Exercise the multi-step + ragged-last-block path (B=603 -> tile=304, grid=2).
    big = jax.random.normal(k_big, (603, OBS_DIM), jnp.float32)
    a2, v2 = policy_forward(big, params)
    jax.block_until_ready((a2, v2))
    r2a, r2v = policy_forward_ref(big, params)
    assert a2.shape == (603, NUM_LOGITS) and v2.shape == (603,)
    assert bool(jnp.allclose(a2, r2a, atol=5e-2, rtol=5e-2))
    assert bool(jnp.allclose(v2, r2v, atol=5e-2, rtol=5e-2))

    print("KERNEL_OK")
</pallas_src>

<mosaic_0001>
module attributes {stable_mosaic.version = 11 : i64} {
  func.func @_policy_kernel(%arg0: i32, %arg1: memref<8x32xf32, #tpu.memory_space<vmem>>, %arg2: memref<32x128xbf16, #tpu.memory_space<vmem>>, %arg3: memref<1x128xf32, #tpu.memory_space<vmem>>, %arg4: memref<128x128xbf16, #tpu.memory_space<vmem>>, %arg5: memref<1x128xf32, #tpu.memory_space<vmem>>, %arg6: memref<8x7xf32, #tpu.memory_space<vmem>>, %arg7: memref<8x1xf32, #tpu.memory_space<vmem>>) attributes {dimension_semantics = [#tpu.dimension_semantics<parallel>], iteration_bounds = array<i64: 1>, scalar_prefetch = 0 : i64, scratch_operands = 0 : i64, tpu.core_type = #tpu.core_type<tc>, window_params = [{transform_indices = @transform_0, window_bounds = array<i64: 8, 32>}, {pipeline_mode = #tpu.pipeline_mode<synchronous>, transform_indices = @transform_1, window_bounds = array<i64: 32, 128>}, {pipeline_mode = #tpu.pipeline_mode<synchronous>, transform_indices = @transform_2, window_bounds = array<i64: 1, 128>}, {pipeline_mode = #tpu.pipeline_mode<synchronous>, transform_indices = @transform_3, window_bounds = array<i64: 128, 128>}, {pipeline_mode = #tpu.pipeline_mode<synchronous>, transform_indices = @transform_4, window_bounds = array<i64: 1, 128>}, {transform_indices = @transform_5, window_bounds = array<i64: 8, 7>}, {transform_indices = @transform_6, window_bounds = array<i64: 8, 1>}]} {
    %c0 = arith.constant 0 : index
    %c0_0 = arith.constant 0 : index
    %0 = vector.load %arg1[%c0, %c0_0] : memref<8x32xf32, #tpu.memory_space<vmem>>, vector<8x32xf32>
    %1 = arith.truncf %0 : vector<8x32xf32> to vector<8x32xbf16>
    %c0_1 = arith.constant 0 : index
    %c0_2 = arith.constant 0 : index
    %2 = vector.load %arg2[%c0_1, %c0_2] : memref<32x128xbf16, #tpu.memory_space<vmem>>, vector<32x128xbf16>
    %cst = arith.constant dense<0.000000e+00> : vector<8x128xf32>
    %3 = tpu.matmul %1, %2, %cst {dimension_numbers = #tpu.dot_dimension_numbers<[1], [0], [0], [1], [0, 0, 1, 1], [], []>} : vector<8x32xbf16>, vector<32x128xbf16>, vector<8x128xf32> -> vector<8x128xf32>
    %c0_3 = arith.constant 0 : index
    %c0_4 = arith.constant 0 : index
    %4 = vector.load %arg3[%c0_3, %c0_4] : memref<1x128xf32, #tpu.memory_space<vmem>>, vector<1x128xf32>
    %5 = vector.broadcast %4 : vector<1x128xf32> to vector<8x128xf32>
    %6 = arith.addf %3, %5 : vector<8x128xf32>
    %cst_5 = arith.constant 0.000000e+00 : f32
    %7 = vector.broadcast %cst_5 : f32 to vector<8x128xf32>
    %8 = arith.maximumf %6, %7 : vector<8x128xf32>
    %9 = arith.truncf %8 : vector<8x128xf32> to vector<8x128xbf16>
    %c0_6 = arith.constant 0 : index
    %c0_7 = arith.constant 0 : index
    %10 = vector.load %arg4[%c0_6, %c0_7] : memref<128x128xbf16, #tpu.memory_space<vmem>>, vector<128x128xbf16>
    %cst_8 = arith.constant dense<0.000000e+00> : vector<8x128xf32>
    %11 = tpu.matmul %9, %10, %cst_8 {dimension_numbers = #tpu.dot_dimension_numbers<[1], [0], [0], [1], [0, 0, 1, 1], [], []>} : vector<8x128xbf16>, vector<128x128xbf16>, vector<8x128xf32> -> vector<8x128xf32>
    %c0_9 = arith.constant 0 : index
    %c0_10 = arith.constant 0 : index
    %12 = vector.load %arg5[%c0_9, %c0_10] : memref<1x128xf32, #tpu.memory_space<vmem>>, vector<1x128xf32>
    %13 = vector.broadcast %12 : vector<1x128xf32> to vector<8x128xf32>
    %14 = arith.addf %11, %13 : vector<8x128xf32>
    %15 = vector.extract_strided_slice %14 {offsets = [0, 0], sizes = [8, 7], strides = [1, 1]} : vector<8x128xf32> to vector<8x7xf32>
    %c0_11 = arith.constant 0 : index
    %c0_12 = arith.constant 0 : index
    %16 = vector.load %arg6[%c0_11, %c0_12] : memref<8x7xf32, #tpu.memory_space<vmem>>, vector<8x7xf32>
    tpu.vector_store %arg6[%c0_11, %c0_12], %15 {strides = array<i32>} : memref<8x7xf32, #tpu.memory_space<vmem>>, vector<8x7xf32>,
    %17 = vector.extract_strided_slice %14 {offsets = [0, 7], sizes = [8, 1], strides = [1, 1]} : vector<8x128xf32> to vector<8x1xf32>
    %c0_13 = arith.constant 0 : index
    %c0_14 = arith.constant 0 : index
    %18 = vector.load %arg7[%c0_13, %c0_14] : memref<8x1xf32, #tpu.memory_space<vmem>>, vector<8x1xf32>
    tpu.vector_store %arg7[%c0_13, %c0_14], %17 {strides = array<i32>} : memref<8x1xf32, #tpu.memory_space<vmem>>, vector<8x1xf32>,
    return
  }
  func.func @transform_0(%arg0: i32) -> (i32, i32) {
    %c0_i32 = arith.constant 0 : i32
    %c0_i32_0 = arith.constant 0 : i32
    return %arg0, %c0_i32 : i32, i32
  }
  func.func @transform_1(%arg0: i32) -> (i32, i32) {
    %c0_i32 = arith.constant 0 : i32
    %c0_i32_0 = arith.constant 0 : i32
    %c0_i32_1 = arith.constant 0 : i32
    return %c0_i32, %c0_i32_0 : i32, i32
  }
  func.func @transform_2(%arg0: i32) -> (i32, i32) {
    %c0_i32 = arith.constant 0 : i32
    %c0_i32_0 = arith.constant 0 : i32
    %c0_i32_1 = arith.constant 0 : i32
    return %c0_i32, %c0_i32_0 : i32, i32
  }
  func.func @transform_3(%arg0: i32) -> (i32, i32) {
    %c0_i32 = arith.constant 0 : i32
    %c0_i32_0 = arith.constant 0 : i32
    %c0_i32_1 = arith.constant 0 : i32
    return %c0_i32, %c0_i32_0 : i32, i32
  }
  func.func @transform_4(%arg0: i32) -> (i32, i32) {
    %c0_i32 = arith.constant 0 : i32
    %c0_i32_0 = arith.constant 0 : i32
    %c0_i32_1 = arith.constant 0 : i32
    return %c0_i32, %c0_i32_0 : i32, i32
  }
  func.func @transform_5(%arg0: i32) -> (i32, i32) {
    %c0_i32 = arith.constant 0 : i32
    %c0_i32_0 = arith.constant 0 : i32
    return %arg0, %c0_i32 : i32, i32
  }
  func.func @transform_6(%arg0: i32) -> (i32, i32) {
    %c0_i32 = arith.constant 0 : i32
    %c0_i32_0 = arith.constant 0 : i32
    return %arg0, %c0_i32 : i32, i32
  }
}

</mosaic_0001>

<bundles_post_ra>
// kernel: policy_forward.1
= control target key start
LH: loop header
LB: loop body
LE: loop exit
PB: predicated region body
PF: predicated region fallthrough
CT: control target
= control target key end

     0   :  { %12 = vsyncpa [#allocation3], 0  ;;  %s446_s0 = inlined_call_operand.hbm [shape: f32[8,32], index: 0, kind: input, shape index: {}]   ;;  %s447_s1 = inlined_call_operand.hbm [shape: bf16[32,128], index: 1, kind: input, shape index: {}]   ;;  %s448_s2 = inlined_call_operand.vmem [shape: f32[1,128], index: 2, kind: input, shape index: {}]   ;;  %s449_s3 = inlined_call_operand.hbm [shape: bf16[128,128], index: 3, kind: input, shape index: {}]   ;;  %s450_s4 = inlined_call_operand.vmem [shape: f32[1,128], index: 4, kind: input, shape index: {}]   ;;  %s451_s5 = inlined_call_operand.hbm [shape: f32[8,7], index: 5, kind: output, shape index: {0}]   ;;  %s452_s6 = inlined_call_operand.vmem [shape: f32[8,1], index: 6, kind: output, shape index: {1}]  }
   0x1   :  { %13 = vsyncpa [#allocation6], 0  ;;  %s30_s23 = sshll.u32 %s447_s1, 4  ;;  %s31_s23 = int_to_ptr.hbm [resolvable:$true] %s30_s23 }
   0x2   :  { %14 = vsyncpa [#allocation4], 0  ;;  %s383_s24 = smov [#allocation5]   ;;  %s20_s28 = sshll.u32 %s446_s0, 4  ;;  %s21_s28 = int_to_ptr.hbm [resolvable:$true] %s20_s28 }
   0x3   :  { %s32_s25 = sshll.u32 %s383_s24, 4  ;;  %s384_s29 = smov 64   ;;  %s33_s25 = int_to_ptr.vmem [resolvable:$true] %s32_s25 }
   0x4   :  { %s385_s30 = smov 4   ;;  %s386_s7 = smov [#allocation2]  }
   0x5   :  { %38 = dma.hbm_to_vmem [thread:$0]  %s31_s23, 256, %s33_s25, [#allocation6], %s384_s29, %s384_s29, %s385_s30  }
   0x6   :  { %s22_s8 = sshll.u32 %s386_s7, 4  ;;  %s45_s11 = sshll.u32 %s449_s3, 4  ;;  %s23_s8 = int_to_ptr.vmem [resolvable:$true] %s22_s8  ;;  %s46_s11 = int_to_ptr.hbm [resolvable:$true] %s45_s11 }
   0x7   :  { %25 = dma.hbm_to_vmem [thread:$0]  %s21_s28, 128, %s23_s8, [#allocation3]  }
   0x8   :  { %s387_s1 = smov [#allocation7]  }
   0x9   :  { %s47_s12 = sshll.u32 %s387_s1, 4  ;;  %s48_s12 = int_to_ptr.vmem [resolvable:$true] %s47_s12 }
   0xa   :  { %53 = dma.hbm_to_vmem [thread:$0]  %s46_s11, 1024, %s48_s12, [#allocation6], %s384_s29, %s384_s29, %s385_s30  }
   0xb   :  { %377 = dma.done.wait [#allocation3], 128  }
   0xc   :  { %378 = vsyncadd [#allocation3], 4294967168 }
   0xd   :  { %379 = dma.done.wait [#allocation6], 1280  }
   0xe   :  { %380 = vsyncadd [#allocation6], 4294966016  ;;  %v263_v0 = vld [vmem:[#allocation5 + $0x8] sm:$0xff]  ;;  %v262_v2 = vld [vmem:[#allocation5] sm:$0xff]  ;;  %vm91_vm0 = vcmask 261120   ;;  %s388_s15 = smov [#allocation8]  }
   0xf   :  { %v271_v1 = vld [vmem:[#allocation7 + $0x38] sm:$0xff]  ;;  %101 = vmatpush.bf16.msra.mxu0 %v263_v0  ;;  %v69_v3 = vld [vmem:[#allocation2] sm:$0xff]  ;;  %v270_v4 = vld [vmem:[#allocation7 + $0x30] sm:$0xff]  ;;  %s204_s16 = sshll.u32 %s388_s15, 4  ;;  %s206_s19 = sshll.u32 %s451_s5, 4  ;;  %vm191_vm1 = vcmask 56320   ;;  %s205_s16 = int_to_ptr.vmem [resolvable:$true] %s204_s16  ;;  %s207_s19 = int_to_ptr.hbm [resolvable:$true] %s206_s19 }
  0x10   :  { %178 = vmatpush.bf16.msra.mxu1 %v271_v1  ;;  %v70_v5 = vpack.c.bf16 %v69_v3, %v69_v3  ;;  %v269_v6 = vld [vmem:[#allocation7 + $0x28] sm:$0xff]  ;;  %v268_v7 = vld [vmem:[#allocation7 + $0x20] sm:$0xff]  ;;  %v267_v8 = vld [vmem:[#allocation7 + $0x18] sm:$0xff]  ;;  %vm197_vm2 = vcmask 7168  }
  0x11   :  { %v266_v9 = vld [vmem:[#allocation7 + $0x10] sm:$0xff]  ;;  %v265_v10 = vld [vmem:[#allocation7 + $0x8] sm:$0xff]  ;;  %v264_v11 = vld [vmem:[#allocation7] sm:$0xff] }
  0x12   :  { %v279_v12 = vld [vmem:[%s448_s2] ss:$0 sm:$0xff]  ;;  %s389_s2 = smov 121  }
  0x13   :  { %102 = vmatpush.bf16.msra.mxu0 %v262_v2  ;;  %v280_v18 = vld [vmem:[%s450_s4] ss:$0 sm:$0xff] }
  0x14   :  { %179 = vmatpush.bf16.msra.mxu1 %v270_v4 }
  0x16   :  { %229 = vmatmul.msk.bf16.vlgmr.msra.gmra.mxu0 %vm91_vm0, %v70_v5 }
  0x18   :  { %180 = vmatpush.bf16.msra.mxu1 %v269_v6 }
  0x1c   :  { %181 = vmatpush.bf16.msra.mxu1 %v268_v7 }
  0x20   :  { %182 = vmatpush.bf16.msra.mxu1 %v267_v8 }
  0x24   :  { %183 = vmatpush.bf16.msra.mxu1 %v266_v9 }
  0x28   :  { %184 = vmatpush.bf16.msra.mxu1 %v265_v10 }
  0x2c   :  { %185 = vmatpush.bf16.msra.mxu1 %v264_v11 }
  0x93   :  { %v104_v13 = vpop.f32.mrf.mxu0 }
  0x94   :  { %v105_v14 = vadd.f32 %v279_v12, %v104_v13 }
  0x96   :  { %v108_v15 = vmax.f32 %v105_v14, 0.0 }
  0x98   :  { %v109_v16 = vpack.c.bf16 %v108_v15, %v108_v15 }
  0x9a   :  { %186 = vmatmul.bf16.vlgmr.msra.gmra.mxu1 %v109_v16 }
  0x9b   :  { %v106_v17 = vpop.f32.mrf.mxu0 }
 0x117   :  { %v187_v19 = vpop.f32.mrf.mxu1 }
 0x118   :  { %v188_v20 = vadd.f32 %v280_v18, %v187_v19 }
 0x11a   :  { %194 = vrot.lane.b32.xlu0 %v188_v20, %s389_s2  ;;  %192 = vst.msk [vmem:[#allocation8] sm:$0xff] %vm191_vm1, %v188_v20 }
 0x11b   :  { %209 = dma.vmem_to_hbm [thread:$0]  %s205_s16, 128, %s207_s19, [#allocation4]  }
 0x11f   :  { %v189_v21 = vpop.f32.mrf.mxu1 }
 0x18c   :  { %v195_v22 = vpop.permute.xlu0 %194 }
 0x18d   :  { %198 = vst.msk [vmem:[%s452_s6] sm:$0xff] %vm197_vm2, %v195_v22 }
 0x18e   :  { %381 = dma.done.wait [#allocation4], 128  }
 0x18f   :  { %382 = vsyncadd [#allocation4], 4294967168 }
 0x190   :  { %218 = vsyncpa [#allocation3], 1 }
 0x191   :  { %219 = vsyncpa [#allocation6], 1 }
 0x192   :  { %220 = vsyncpa [#allocation4], 1 }

</bundles_post_ra>
